<compile_context>
chip_gen: v5e
topology: v5e:2x2
jax: 0.10.0
libtpu: 0.0.40
codegen_flags: <defaults>
</compile_context>

<pallas_src>
import functools

import jax
import jax.numpy as jnp
from jax import lax
from jax.experimental import pallas as pl
from jax.experimental.pallas import tpu as pltpu


def _vmem_limit_bytes():
    """Generation-aware scoped-VMEM budget (v5e/v6e ~76 MiB, v7x ~38 MiB)."""
    try:
        cap = int(pltpu.get_tpu_info().vmem_capacity_bytes)
    except Exception:
        cap = 64 * 1024 * 1024
    return max(32 * 1024 * 1024, min(int(cap * 0.6), 96 * 1024 * 1024))


VMEM_LIMIT = _vmem_limit_bytes()


def _pick_tile(dim, candidates=(512, 256, 128)):
    """Largest candidate tile that evenly divides `dim`, else the full dim (valid per (8,128) rule)."""
    for c in candidates:
        if dim >= c and dim % c == 0:
            return c
    return dim


def _pick_batch_tile(b):
    for c in (16, 8):
        if b >= c and b % c == 0:
            return c
    return b


def _gelu(y):
    # erf-based GELU (BERT default), computed in f32
    return 0.5 * y * (1.0 + lax.erf(y * 0.7071067811865476))


# ----------------------------------------------------------------------------
# Linear (+ optional GELU). Full-K weight-resident path for K <= 4096,
# tiled K-reduction path otherwise. bf16 MXU operands, f32 accumulation.
# ----------------------------------------------------------------------------
def _linear_kernel_fullk(x_ref, w_ref, b_ref, o_ref, *, activation):
    y = jnp.dot(x_ref[...], w_ref[...], preferred_element_type=jnp.float32) + b_ref[...]
    if activation == "gelu":
        y = _gelu(y)
    o_ref[...] = y.astype(o_ref.dtype)


def _linear_kernel_redk(x_ref, w_ref, b_ref, o_ref, acc_ref, *, activation, n_k):
    @pl.when(pl.program_id(2) == 0)
    def _():
        acc_ref[...] = jnp.zeros_like(acc_ref)

    acc_ref[...] += jnp.dot(x_ref[...], w_ref[...], preferred_element_type=jnp.float32)

    @pl.when(pl.program_id(2) == n_k - 1)
    def _():
        y = acc_ref[...] + b_ref[...]
        if activation == "gelu":
            y = _gelu(y)
        o_ref[...] = y.astype(o_ref.dtype)


def linear(x, w, b, activation=None, out_dtype=jnp.bfloat16):
    """x: (M, K) bf16, w: (K, N) bf16, b: (N,) f32 -> (M, N) out_dtype."""
    M, K = x.shape
    N = w.shape[1]
    tm, tn = _pick_tile(M), _pick_tile(N)
    b2 = b.reshape(1, N)

    if K <= 4096:
        # Full-K block: the (K, tn) weight block stays VMEM-resident, no reduction axis.
        return pl.pallas_call(
            functools.partial(_linear_kernel_fullk, activation=activation),
            out_shape=jax.ShapeDtypeStruct((M, N), out_dtype),
            grid=(M // tm, N // tn),
            in_specs=[pl.BlockSpec((tm, K), lambda i, j: (i, 0)),
                      pl.BlockSpec((K, tn), lambda i, j: (0, j)),
                      pl.BlockSpec((1, tn), lambda i, j: (0, j))],
            out_specs=pl.BlockSpec((tm, tn), lambda i, j: (i, j)),
            compiler_params=pltpu.CompilerParams(
                dimension_semantics=("parallel", "parallel"),
                vmem_limit_bytes=VMEM_LIMIT),
        )(x, w, b2)

    # Large-K fallback: tiled K-reduction with an f32 VMEM accumulator.
    # TODO(synk): sweep pipeline_mode=pl.Buffered(3) on the weight spec if DMA waits show up.
    tk = _pick_tile(K)
    n_k = K // tk
    return pl.pallas_call(
        functools.partial(_linear_kernel_redk, activation=activation, n_k=n_k),
        out_shape=jax.ShapeDtypeStruct((M, N), out_dtype),
        grid_spec=pltpu.PrefetchScalarGridSpec(
            num_scalar_prefetch=0,
            grid=(M // tm, N // tn, n_k),
            in_specs=[pl.BlockSpec((tm, tk), lambda i, j, k: (i, k)),
                      pl.BlockSpec((tk, tn), lambda i, j, k: (k, j)),
                      pl.BlockSpec((1, tn), lambda i, j, k: (0, j))],
            out_specs=pl.BlockSpec((tm, tn), lambda i, j, k: (i, j)),
            scratch_shapes=[pltpu.VMEM((tm, tn), jnp.float32)]),
        compiler_params=pltpu.CompilerParams(
            dimension_semantics=("parallel", "parallel", "arbitrary"),
            vmem_limit_bytes=VMEM_LIMIT),
    )(x, w, b2)


# ----------------------------------------------------------------------------
# Linear + residual add + LayerNorm fused (full-K, full-N, weight VMEM-resident)
# ----------------------------------------------------------------------------
def _linear_res_ln_kernel(x_ref, w_ref, b_ref, r_ref, g_ref, bt_ref, o_ref, *, eps):
    y = jnp.dot(x_ref[...], w_ref[...], preferred_element_type=jnp.float32)
    y = y + b_ref[...] + r_ref[...].astype(jnp.float32)
    mu = jnp.mean(y, axis=-1, keepdims=True)
    yc = y - mu
    var = jnp.mean(yc * yc, axis=-1, keepdims=True)
    o_ref[...] = (yc * lax.rsqrt(var + eps) * g_ref[...] + bt_ref[...]).astype(o_ref.dtype)


def linear_residual_ln(x, w, b, residual, gamma, beta, eps=1e-12):
    """LayerNorm((x @ w + b) + residual) * gamma + beta -> bf16 (M, N)."""
    M, K = x.shape
    N = w.shape[1]
    tm = _pick_tile(M)
    return pl.pallas_call(
        functools.partial(_linear_res_ln_kernel, eps=eps),
        out_shape=jax.ShapeDtypeStruct((M, N), jnp.bfloat16),
        grid=(M // tm,),
        in_specs=[pl.BlockSpec((tm, K), lambda i: (i, 0)),
                  pl.BlockSpec((K, N), lambda i: (0, 0)),
                  pl.BlockSpec((1, N), lambda i: (0, 0)),
                  pl.BlockSpec((tm, N), lambda i: (i, 0)),
                  pl.BlockSpec((1, N), lambda i: (0, 0)),
                  pl.BlockSpec((1, N), lambda i: (0, 0))],
        out_specs=pl.BlockSpec((tm, N), lambda i: (i, 0)),
        compiler_params=pltpu.CompilerParams(
            dimension_semantics=("parallel",),
            vmem_limit_bytes=VMEM_LIMIT),
    )(x, w, b.reshape(1, N), residual, gamma.reshape(1, N), beta.reshape(1, N))


# ----------------------------------------------------------------------------
# Standalone LayerNorm — used once for the embeddings
# ----------------------------------------------------------------------------
def _layernorm_kernel(x_ref, g_ref, b_ref, o_ref, *, eps):
    x = x_ref[...].astype(jnp.float32)
    mu = jnp.mean(x, axis=-1, keepdims=True)
    xc = x - mu
    var = jnp.mean(xc * xc, axis=-1, keepdims=True)
    o_ref[...] = (xc * lax.rsqrt(var + eps) * g_ref[...] + b_ref[...]).astype(o_ref.dtype)


def layernorm(x, g, b, eps=1e-12):
    M, H = x.shape
    tm = _pick_tile(M)
    return pl.pallas_call(
        functools.partial(_layernorm_kernel, eps=eps),
        out_shape=jax.ShapeDtypeStruct((M, H), jnp.bfloat16),
        grid=(M // tm,),
        in_specs=[pl.BlockSpec((tm, H), lambda i: (i, 0)),
                  pl.BlockSpec((1, H), lambda i: (0, 0)),
                  pl.BlockSpec((1, H), lambda i: (0, 0))],
        out_specs=pl.BlockSpec((tm, H), lambda i: (i, 0)),
        compiler_params=pltpu.CompilerParams(
            dimension_semantics=("parallel",),
            vmem_limit_bytes=VMEM_LIMIT),
    )(x, g.reshape(1, H), b.reshape(1, H))


# ----------------------------------------------------------------------------
# Multi-head self-attention on the fused QKV slab (one grid step per batch element).
# Per-head ref slicing for loads and direct per-head o_ref writes (no concat, no full slab load).
# ----------------------------------------------------------------------------
def _attention_kernel(qkv_ref, m_ref, o_ref, *, num_heads, head_dim, scale):
    mask = m_ref[0]                              # (1, S) additive bias, broadcasts over rows
    H = num_heads * head_dim
    # TODO(synk): at dh<128 per-head lane slices are partially masked; a head-major (B,3,nH,S,dh)
    #             layout fed via BlockSpec/grid=(B,nH) would remove the lane selects, at the cost
    #             of a wrapper-side transpose.
    for h in range(num_heads):
        qh = qkv_ref[0, :, h * head_dim:(h + 1) * head_dim]                    # (S, dh) bf16
        kh = qkv_ref[0, :, H + h * head_dim:H + (h + 1) * head_dim]            # (S, dh) bf16
        vh = qkv_ref[0, :, 2 * H + h * head_dim:2 * H + (h + 1) * head_dim]    # (S, dh) bf16
        # contract the dh axis of both operands directly (no k.T transpose in VMEM)
        s = lax.dot_general(qh, kh, (((1,), (1,)), ((), ())),
                            preferred_element_type=jnp.float32) * scale + mask
        s = s - jnp.max(s, axis=-1, keepdims=True)
        p = jnp.exp(s)
        p = p * pl.reciprocal(jnp.sum(p, axis=-1, keepdims=True), approx=True)
        ctx = jnp.dot(p.astype(jnp.bfloat16), vh, preferred_element_type=jnp.float32)
        o_ref[0, :, h * head_dim:(h + 1) * head_dim] = ctx.astype(o_ref.dtype)


def mha_attention(qkv, mask_bias, num_heads, head_dim, scale):
    """qkv: (B, S, 3H) bf16; mask_bias: (B, 1, S) f32 additive bias -> (B, S, H) bf16 context."""
    B, S, H3 = qkv.shape
    H = H3 // 3
    return pl.pallas_call(
        functools.partial(_attention_kernel, num_heads=num_heads, head_dim=head_dim, scale=scale),
        out_shape=jax.ShapeDtypeStruct((B, S, H), jnp.bfloat16),
        grid=(B,),
        in_specs=[pl.BlockSpec((1, S, H3), lambda b: (b, 0, 0)),
                  pl.BlockSpec((1, 1, S), lambda b: (b, 0, 0))],
        out_specs=pl.BlockSpec((1, S, H), lambda b: (b, 0, 0)),
        compiler_params=pltpu.CompilerParams(
            dimension_semantics=("parallel",),
            vmem_limit_bytes=VMEM_LIMIT),
    )(qkv, mask_bias)


# ----------------------------------------------------------------------------
# BiLSTM recurrence: time-major, batch-tiled, input projection hoisted out.
# Forward/backward halves written directly into o_ref (no scratch, no concat).
# ----------------------------------------------------------------------------
def _bilstm_kernel(gx_ref, whf_ref, whb_ref, o_ref, *, seq_len, hh):
    # gx_ref: (S, tb, 8*hh) bf16 precomputed input gates (+bias), cols [0:4hh] fwd, [4hh:8hh] bwd
    #         (PyTorch gate order i, f, g, o).
    # o_ref:  (S, tb, 2*hh) bf16; [:, :, :hh] forward, [:, :, hh:] backward (concat order).
    tb = gx_ref.shape[1]
    whf = whf_ref[...]   # (hh, 4hh) bf16
    whb = whb_ref[...]

    def gates(g, c):
        i_g = jax.nn.sigmoid(g[:, 0 * hh:1 * hh])
        f_g = jax.nn.sigmoid(g[:, 1 * hh:2 * hh])
        g_g = jnp.tanh(g[:, 2 * hh:3 * hh])
        o_g = jax.nn.sigmoid(g[:, 3 * hh:4 * hh])
        c_new = f_g * c + i_g * g_g
        h_new = o_g * jnp.tanh(c_new)
        return h_new, c_new

    h0 = jnp.zeros((tb, hh), jnp.float32)
    c0 = jnp.zeros((tb, hh), jnp.float32)

    def body(t, carry):
        hf, cf, hb, cb = carry
        tr = seq_len - 1 - t
        gx_f = gx_ref[t, :, 0:4 * hh].astype(jnp.float32)        # (tb, 4hh)
        gx_b = gx_ref[tr, :, 4 * hh:8 * hh].astype(jnp.float32)  # (tb, 4hh)
        gf = gx_f + jnp.dot(hf.astype(jnp.bfloat16), whf, preferred_element_type=jnp.float32)
        gb = gx_b + jnp.dot(hb.astype(jnp.bfloat16), whb, preferred_element_type=jnp.float32)
        hf, cf = gates(gf, cf)
        hb, cb = gates(gb, cb)
        o_ref[t, :, 0:hh] = hf.astype(o_ref.dtype)
        o_ref[tr, :, hh:2 * hh] = hb.astype(o_ref.dtype)
        return (hf, cf, hb, cb)

    lax.fori_loop(0, seq_len, body, (h0, c0, h0, c0))


def bilstm(x_flat, p, *, B, S, H):
    """Bidirectional single-layer LSTM. x_flat: (B*S, H) bf16 (batch-major rows) ->
    (S, B, H) bf16 time-major output."""
    hh = H // 2
    # Time-major so each recurrent step loads/stores a dense (tb, x) tile.
    x_tm = jnp.transpose(x_flat.reshape(B, S, H), (1, 0, 2))                      # (S, B, H)
    # Hoisted input projection: X @ [W_ih_f | W_ih_b] + b as one pipelined matmul.
    gx = linear(x_tm.reshape(S * B, H), p["w_ih"], p["b_ih"]).reshape(S, B, 8 * hh)
    tb = _pick_batch_tile(B)
    return pl.pallas_call(
        functools.partial(_bilstm_kernel, seq_len=S, hh=hh),
        out_shape=jax.ShapeDtypeStruct((S, B, 2 * hh), jnp.bfloat16),
        grid=(B // tb,),
        in_specs=[pl.BlockSpec((S, tb, 8 * hh), lambda i: (0, i, 0)),
                  pl.BlockSpec((hh, 4 * hh), lambda i: (0, 0)),
                  pl.BlockSpec((hh, 4 * hh), lambda i: (0, 0))],
        out_specs=pl.BlockSpec((S, tb, 2 * hh), lambda i: (0, i, 0)),
        compiler_params=pltpu.CompilerParams(
            dimension_semantics=("parallel",),
            vmem_limit_bytes=VMEM_LIMIT),
    )(gx, p["w_hh_f"], p["w_hh_b"])


# ----------------------------------------------------------------------------
# Model glue: BERT encoder + BiLSTM + fused classifier heads
# ----------------------------------------------------------------------------
def bert_encoder(p, input_ids, attention_mask, token_type_ids):
    B, S = input_ids.shape
    H = p["word_emb"].shape[1]
    nH = p["num_heads"]
    dh = H // nH
    scale = 1.0 / (dh ** 0.5)

    pos_ids = jnp.arange(S)[None, :]
    emb = (p["word_emb"][input_ids].astype(jnp.float32)
           + p["pos_emb"][pos_ids].astype(jnp.float32)
           + p["tok_emb"][token_type_ids].astype(jnp.float32))
    h = layernorm(emb.reshape(B * S, H), p["emb_ln_g"], p["emb_ln_b"])            # (B*S, H) bf16

    # (B, 1, S) additive mask bias — per-head broadcast happens inside the attention kernel.
    mask_bias = ((1.0 - attention_mask.astype(jnp.float32)) * -10000.0)[:, None, :]

    for lp in p["layers"]:
        qkv = linear(h, lp["w_qkv"], lp["b_qkv"])                                 # (B*S, 3H) bf16
        ctx = mha_attention(qkv.reshape(B, S, 3 * H), mask_bias, nH, dh, scale)   # (B, S, H) bf16
        # attention output projection + residual + LayerNorm fused
        h = linear_residual_ln(ctx.reshape(B * S, H), lp["wo"], lp["bo"],
                               h, lp["ln1_g"], lp["ln1_b"])
        inter = linear(h, lp["wi"], lp["bi"], activation="gelu")                  # (B*S, I) bf16
        # FFN output projection + residual + LayerNorm fused
        h = linear_residual_ln(inter, lp["wo2"], lp["bo2"],
                               h, lp["ln2_g"], lp["ln2_b"])
    return h                                                                      # (B*S, H) bf16


def bert_lstm_crf_forward(params, input_ids, attention_mask, token_type_ids=None):
    B, S = input_ids.shape
    if token_type_ids is None:
        token_type_ids = jnp.zeros_like(input_ids)
    bert_p = params["bert"]
    H = bert_p["word_emb"].shape[1]

    sequence_output = bert_encoder(bert_p, input_ids, attention_mask, token_type_ids)  # (B*S, H)
    # dropout -> identity (eval)
    lstm_tm = bilstm(sequence_output, params["lstm"], B=B, S=S, H=H)                    # (S, B, H)
    # dropout -> identity (eval)

    # Fused, lane-dense classifier heads (packed once at init into w_cls / b_cls).
    ni, ns = params["num_intent"], params["num_slot"]
    logits = linear(lstm_tm.reshape(S * B, H), params["w_cls"], params["b_cls"],
                    out_dtype=jnp.float32).reshape(S, B, -1)
    intent_logits = logits[0, :, :ni]                                 # intent head on token t=0
    slot_logits = jnp.transpose(logits[:, :, ni:ni + ns], (1, 0, 2))  # (B, S, ns)
    return intent_logits, slot_logits


# ----------------------------------------------------------------------------
# Deterministic parameter init (weights pre-cast to bf16, heads/LSTM pre-packed)
# ----------------------------------------------------------------------------
def init_params(key, *, vocab=100, hidden=32, num_heads=4, num_layers=2,
                intermediate=64, max_pos=64, type_vocab=2, num_intent=5, num_slot=7):
    keys = iter(jax.random.split(key, 256))
    bf16 = jnp.bfloat16

    def w(shape, scale=0.02, dtype=bf16):
        return (scale * jax.random.normal(next(keys), shape)).astype(dtype)

    def zeros(shape, dtype=jnp.float32):
        return jnp.zeros(shape, dtype)

    def ones(shape):
        return jnp.ones(shape, jnp.float32)

    hh = hidden // 2
    bert = dict(
        word_emb=w((vocab, hidden)),
        pos_emb=w((max_pos, hidden)),
        tok_emb=w((type_vocab, hidden)),
        emb_ln_g=ones((hidden,)), emb_ln_b=zeros((hidden,)),
        num_heads=num_heads,
        layers=[dict(
            w_qkv=w((hidden, 3 * hidden)), b_qkv=zeros((3 * hidden,)),   # fused Q|K|V
            wo=w((hidden, hidden)), bo=zeros((hidden,)),
            ln1_g=ones((hidden,)), ln1_b=zeros((hidden,)),
            wi=w((hidden, intermediate)), bi=zeros((intermediate,)),
            wo2=w((intermediate, hidden)), bo2=zeros((hidden,)),
            ln2_g=ones((hidden,)), ln2_b=zeros((hidden,)),
        ) for _ in range(num_layers)],
    )
    # BiLSTM: input-side weights/biases pre-concatenated (forward | backward) at init.
    lstm = dict(
        w_ih=jnp.concatenate([w((hidden, 4 * hh)), w((hidden, 4 * hh))], axis=1),  # (H, 8hh) bf16
        b_ih=zeros((8 * hh,)),
        w_hh_f=w((hh, 4 * hh)), w_hh_b=w((hh, 4 * hh)),
    )
    # Fused, lane-dense classifier head [intent | slot], padded to a multiple of 128 columns.
    ntot = num_intent + num_slot
    n_pad = max(128, ((ntot + 127) // 128) * 128)
    w_cls = jnp.zeros((hidden, n_pad), bf16)
    w_cls = w_cls.at[:, :num_intent].set(w((hidden, num_intent)))
    w_cls = w_cls.at[:, num_intent:ntot].set(w((hidden, num_slot)))
    b_cls = jnp.zeros((n_pad,), jnp.float32)

    return dict(bert=bert, lstm=lstm, w_cls=w_cls, b_cls=b_cls,
                num_intent=num_intent, num_slot=num_slot)


if __name__ == "__main__":
    key = jax.random.PRNGKey(0)
    pkey, dkey = jax.random.split(key)

    NUM_INTENT, NUM_SLOT = 5, 7
    params = init_params(pkey, num_intent=NUM_INTENT, num_slot=NUM_SLOT)

    B, S = 2, 8
    input_ids = jax.random.randint(dkey, (B, S), 0, 100)
    attention_mask = jnp.ones((B, S), jnp.int32)
    token_type_ids = jnp.zeros((B, S), jnp.int32)

    intent_logits, slot_logits = bert_lstm_crf_forward(
        params, input_ids, attention_mask, token_type_ids)
    jax.block_until_ready((intent_logits, slot_logits))

    assert intent_logits.shape == (B, NUM_INTENT)
    assert slot_logits.shape == (B, S, NUM_SLOT)
    assert bool(jnp.all(jnp.isfinite(intent_logits))) and bool(jnp.all(jnp.isfinite(slot_logits)))
    print("KERNEL_OK")
</pallas_src>

<mosaic_0001>
module attributes {stable_mosaic.version = 11 : i64} {
  func.func @_layernorm_kernel(%arg0: i32, %arg1: memref<16x32xf32, #tpu.memory_space<vmem>>, %arg2: memref<1x32xf32, #tpu.memory_space<vmem>>, %arg3: memref<1x32xf32, #tpu.memory_space<vmem>>, %arg4: memref<16x32xbf16, #tpu.memory_space<vmem>>) attributes {dimension_semantics = [#tpu.dimension_semantics<parallel>], iteration_bounds = array<i64: 1>, scalar_prefetch = 0 : i64, scratch_operands = 0 : i64, tpu.core_type = #tpu.core_type<tc>, window_params = [{transform_indices = @transform_0, window_bounds = array<i64: 16, 32>}, {pipeline_mode = #tpu.pipeline_mode<synchronous>, transform_indices = @transform_1, window_bounds = array<i64: 1, 32>}, {pipeline_mode = #tpu.pipeline_mode<synchronous>, transform_indices = @transform_2, window_bounds = array<i64: 1, 32>}, {transform_indices = @transform_3, window_bounds = array<i64: 16, 32>}]} {
    %c0 = arith.constant 0 : index
    %c0_0 = arith.constant 0 : index
    %0 = vector.load %arg1[%c0, %c0_0] : memref<16x32xf32, #tpu.memory_space<vmem>>, vector<16x32xf32>
    %cst = arith.constant dense<0.000000e+00> : vector<16xf32>
    %1 = vector.multi_reduction <add>, %0, %cst [1] : vector<16x32xf32> to vector<16xf32>
    %2 = vector.shape_cast %1 : vector<16xf32> to vector<16x1xf32>
    %cst_1 = arith.constant 3.200000e+01 : f32
    %3 = vector.broadcast %cst_1 : f32 to vector<16x1xf32>
    %4 = arith.divf %2, %3 : vector<16x1xf32>
    %5 = vector.broadcast %4 : vector<16x1xf32> to vector<16x32xf32>
    %6 = arith.subf %0, %5 : vector<16x32xf32>
    %7 = arith.mulf %6, %6 : vector<16x32xf32>
    %cst_2 = arith.constant dense<0.000000e+00> : vector<16xf32>
    %8 = vector.multi_reduction <add>, %7, %cst_2 [1] : vector<16x32xf32> to vector<16xf32>
    %9 = vector.shape_cast %8 : vector<16xf32> to vector<16x1xf32>
    %cst_3 = arith.constant 3.200000e+01 : f32
    %10 = vector.broadcast %cst_3 : f32 to vector<16x1xf32>
    %11 = arith.divf %9, %10 : vector<16x1xf32>
    %cst_4 = arith.constant 9.99999996E-13 : f32
    %12 = vector.broadcast %cst_4 : f32 to vector<16x1xf32>
    %13 = arith.addf %11, %12 : vector<16x1xf32>
    %14 = math.rsqrt %13 : vector<16x1xf32>
    %15 = vector.broadcast %14 : vector<16x1xf32> to vector<16x32xf32>
    %16 = arith.mulf %6, %15 : vector<16x32xf32>
    %c0_5 = arith.constant 0 : index
    %c0_6 = arith.constant 0 : index
    %17 = vector.load %arg2[%c0_5, %c0_6] : memref<1x32xf32, #tpu.memory_space<vmem>>, vector<1x32xf32>
    %18 = vector.broadcast %17 : vector<1x32xf32> to vector<16x32xf32>
    %19 = arith.mulf %16, %18 : vector<16x32xf32>
    %c0_7 = arith.constant 0 : index
    %c0_8 = arith.constant 0 : index
    %20 = vector.load %arg3[%c0_7, %c0_8] : memref<1x32xf32, #tpu.memory_space<vmem>>, vector<1x32xf32>
    %21 = vector.broadcast %20 : vector<1x32xf32> to vector<16x32xf32>
    %22 = arith.addf %19, %21 : vector<16x32xf32>
    %23 = arith.truncf %22 : vector<16x32xf32> to vector<16x32xbf16>
    %c0_9 = arith.constant 0 : index
    %c0_10 = arith.constant 0 : index
    %24 = vector.load %arg4[%c0_9, %c0_10] : memref<16x32xbf16, #tpu.memory_space<vmem>>, vector<16x32xbf16>
    tpu.vector_store %arg4[%c0_9, %c0_10], %23 {strides = array<i32>} : memref<16x32xbf16, #tpu.memory_space<vmem>>, vector<16x32xbf16>,
    return
  }
  func.func @transform_0(%arg0: i32) -> (i32, i32) {
    %c0_i32 = arith.constant 0 : i32
    %c0_i32_0 = arith.constant 0 : i32
    return %arg0, %c0_i32 : i32, i32
  }
  func.func @transform_1(%arg0: i32) -> (i32, i32) {
    %c0_i32 = arith.constant 0 : i32
    %c0_i32_0 = arith.constant 0 : i32
    %c0_i32_1 = arith.constant 0 : i32
    return %c0_i32, %c0_i32_0 : i32, i32
  }
  func.func @transform_2(%arg0: i32) -> (i32, i32) {
    %c0_i32 = arith.constant 0 : i32
    %c0_i32_0 = arith.constant 0 : i32
    %c0_i32_1 = arith.constant 0 : i32
    return %c0_i32, %c0_i32_0 : i32, i32
  }
  func.func @transform_3(%arg0: i32) -> (i32, i32) {
    %c0_i32 = arith.constant 0 : i32
    %c0_i32_0 = arith.constant 0 : i32
    return %arg0, %c0_i32 : i32, i32
  }
}

</mosaic_0001>

<bundles_post_ra>
// kernel: tpu_custom_call.1
= control target key start
LH: loop header
LB: loop body
LE: loop exit
PB: predicated region body
PF: predicated region fallthrough
CT: control target
= control target key end

     0   :  { %8 = vsyncpa [#allocation3], 0  ;;  %s274_s0 = inlined_call_operand.hbm [shape: f32[16,32], index: 0, kind: input, shape index: {}]   ;;  %s275_s1 = inlined_call_operand.hbm [shape: f32[1,32], index: 1, kind: input, shape index: {}]   ;;  %s276_s2 = inlined_call_operand.vmem [shape: f32[1,32], index: 2, kind: input, shape index: {}]   ;;  %s277_s3 = inlined_call_operand.hbm [shape: bf16[16,32], index: 3, kind: output, shape index: {}]  }
   0x1   :  { %9 = vsyncpa [#allocation6], 0 }
   0x2   :  { %10 = vsyncpa [#allocation4], 0  ;;  %s15_s14 = sshll.u32 %s274_s0, 4  ;;  %s230_s15 = smov [#allocation2]   ;;  %s16_s14 = int_to_ptr.hbm [resolvable:$true] %s15_s14 }
   0x3   :  { %s17_s16 = sshll.u32 %s230_s15, 4  ;;  %s29_s19 = sshll.u32 %s275_s1, 4  ;;  %s18_s16 = int_to_ptr.vmem [resolvable:$true] %s17_s16  ;;  %s30_s19 = int_to_ptr.hbm [resolvable:$true] %s29_s19 }
   0x4   :  { %s231_s20 = smov 128   ;;  %s232_s21 = smov 8  }
   0x5   :  { %23 = dma.hbm_to_vmem [thread:$0]  %s16_s14, 256, %s18_s16, [#allocation3], %s231_s20, %s231_s20, %s232_s21  }
   0x6   :  { %s233_s22 = smov [#allocation5]  }
   0x7   :  { %s31_s23 = sshll.u32 %s233_s22, 4  ;;  %s32_s23 = int_to_ptr.vmem [resolvable:$true] %s31_s23 }
   0x8   :  { %34 = dma.hbm_to_vmem [thread:$0]  %s30_s19, 16, %s32_s23, [#allocation6]  }
   0x9   :  { %224 = dma.done.wait [#allocation3], 256  }
   0xa   :  { %225 = vsyncadd [#allocation3], 4294967040 }
   0xb   :  { %226 = dma.done.wait [#allocation6], 16  }
   0xc   :  { %227 = vsyncadd [#allocation6], 4294967280  ;;  %vm47_vm0 = vcmask 261120   ;;  %v45_v0 = vld [vmem:[#allocation2] sm:$0xff]  ;;  %v46_v2 = vld [vmem:[#allocation2 + $0x8] sm:$0xff]  ;;  %v234_v4 = vmov 32.0  }
   0xd   :  { %v48_v1 = vsel %vm47_vm0, %v45_v0, 0.0  ;;  %v51_v3 = vsel %vm47_vm0, %v46_v2, 0.0  ;;  %146 = vrcp.f32 %v234_v4  ;;  %v144_v35 = vld [vmem:[#allocation5] ss:$0 sm:$0xff]  ;;  %v145_v38 = vld [vmem:[%s276_s2] ss:$0 sm:$0xff] }
   0xe   :  { %49 = vadd.xlane.f32.xlu0 %v48_v1  ;;  %vm113_vm7 = vcmask 257024   ;;  %s235_s24 = smov [#allocation7]   ;;  %s122_s2 = sshll.u32 %s277_s3, 4  ;;  %s123_s2 = int_to_ptr.hbm [resolvable:$true] %s122_s2 }
   0xf   :  { %s120_s25 = sshll.u32 %s235_s24, 4  ;;  %s236_s28 = smov 64   ;;  %s121_s25 = int_to_ptr.vmem [resolvable:$true] %s120_s25 }
  0x10   :  { %s237_s29 = smov 4  }
  0x13   :  { %v147_v5 = vpop.eup %146 }
  0x14   :  { %v55_v6 = vmul.f32 32.0, %v147_v5  ;;  %vm59_vm1 = vweird.f32 %v147_v5 }
  0x16   :  { %52 = vadd.xlane.f32.xlu0 %v51_v3  ;;  %v56_v7 = vsub.f32 1.0, %v55_v6 }
  0x18   :  { %v57_v8 = vmul.f32 %v147_v5, %v56_v7 }
  0x1a   :  { %v58_v9 = vadd.f32 %v147_v5, %v57_v8 }
  0x1c   :  { %v60_v10 = vsel %vm59_vm1, %v147_v5, %v58_v9 }
  0x81   :  { %v50_v11 = vpop.xlane.xlu0 %49 }
  0x82   :  { %v61_v12 = vmul.f32 %v60_v10, %v50_v11 }
  0x84   :  { %v63_v13 = vsub.f32 %v45_v0, %v61_v12 }
  0x86   :  { %v65_v14 = vmul.f32 %v63_v13, %v63_v13 }
  0x88   :  { %v67_v15 = vsel %vm47_vm0, %v65_v14, 0.0 }
  0x89   :  { %68 = vadd.xlane.f32.xlu1 %v67_v15  ;;  %v53_v16 = vpop.xlane.xlu0 %52 }
  0x8a   :  { %v62_v17 = vmul.f32 %v60_v10, %v53_v16 }
  0x8c   :  { %v64_v18 = vsub.f32 %v46_v2, %v62_v17 }
  0x8e   :  { %v66_v19 = vmul.f32 %v64_v18, %v64_v18 }
  0x90   :  { %v70_v20 = vsel %vm47_vm0, %v66_v19, 0.0 }
  0x91   :  { %71 = vadd.xlane.f32.xlu1 %v70_v20 }
  0xfc   :  { %v69_v21 = vpop.xlane.xlu1 %68 }
  0xfd   :  { %v73_v22 = vmul.f32 %v69_v21, %v60_v10 }
  0xff   :  { %v75_v23 = vadd.f32 1e-12, %v73_v22 }
 0x101   :  { %148 = vrsqrt.f32 %v75_v23  ;;  %vm83_vm3 = vweird.f32 %v75_v23 }
 0x104   :  { %v72_v24 = vpop.xlane.xlu1 %71 }
 0x105   :  { %v74_v25 = vmul.f32 %v72_v24, %v60_v10 }
 0x107   :  { %v149_v26 = vpop.eup %148  ;;  %v76_v27 = vadd.f32 1e-12, %v74_v25 }
 0x108   :  { %v78_v28 = vmul.f32 %v149_v26, %v75_v23  ;;  %vm84_vm2 = vweird.f32 %v149_v26 }
 0x109   :  { %150 = vrsqrt.f32 %v76_v27  ;;  %vm85_vm4 = vmor %vm83_vm3, %vm84_vm2  ;;  %vm93_vm6 = vweird.f32 %v76_v27 }
 0x10a   :  { %v79_v29 = vmul.f32 %v149_v26, %v78_v28 }
 0x10c   :  { %v80_v30 = vmul.f32 0.5, %v79_v29 }
 0x10e   :  { %v81_v31 = vsub.f32 1.5, %v80_v30 }
 0x10f   :  { %v151_v32 = vpop.eup %150 }
 0x110   :  { %v82_v33 = vmul.f32 %v149_v26, %v81_v31  ;;  %v88_v34 = vmul.f32 %v151_v32, %v76_v27  ;;  %vm94_vm5 = vweird.f32 %v151_v32 }
 0x111   :  { %vm95_vm8 = vmor %vm93_vm6, %vm94_vm5 }
 0x112   :  { %v86_v36 = vsel %vm85_vm4, %v149_v26, %v82_v33  ;;  %v89_v37 = vmul.f32 %v151_v32, %v88_v34 }
 0x113   :  { %v97_v39 = vmul.f32 %v86_v36, %v63_v13 }
 0x114   :  { %v90_v40 = vmul.f32 0.5, %v89_v37 }
 0x115   :  { %v103_v41 = vmul.f32 %v144_v35, %v97_v39 }
 0x116   :  { %v91_v42 = vsub.f32 1.5, %v90_v40 }
 0x117   :  { %v109_v43 = vadd.f32 %v145_v38, %v103_v41 }
 0x118   :  { %v92_v44 = vmul.f32 %v151_v32, %v91_v42 }
 0x119   :  { %v111_v45 = vpack.c.bf16 %v109_v43, %v109_v43 }
 0x11a   :  { %v96_v46 = vsel %vm95_vm8, %v151_v32, %v92_v44 }
 0x11b   :  { %v98_v47 = vmul.f32 %v96_v46, %v64_v18  ;;  %114 = vst.msk [vmem:[#allocation7] sm:$0xf] %vm113_vm7, %v111_v45 }
 0x11d   :  { %v104_v48 = vmul.f32 %v144_v35, %v98_v47 }
 0x11f   :  { %v110_v49 = vadd.f32 %v145_v38, %v104_v48 }
 0x121   :  { %v112_v50 = vpack.c.bf16 %v110_v49, %v110_v49 }
 0x123   :  { %115 = vst.msk [vmem:[#allocation7 + $0x4] sm:$0xf] %vm113_vm7, %v112_v50 }
 0x124   :  { %128 = dma.vmem_to_hbm [thread:$0]  %s121_s25, 128, %s123_s2, [#allocation4], %s236_s28, %s236_s28, %s237_s29  }
 0x125   :  { %228 = dma.done.wait [#allocation4], 128  }
 0x126   :  { %229 = vsyncadd [#allocation4], 4294967168 }
 0x127   :  { %133 = vsyncpa [#allocation3], 1 }
 0x128   :  { %134 = vsyncpa [#allocation6], 1 }
 0x129   :  { %135 = vsyncpa [#allocation4], 1 }

</bundles_post_ra>
